<compile_context>
chip_gen: v6e
topology: v6e:2x2x1
jax: 0.10.0
libtpu: 0.0.40
codegen_flags: <defaults>
</compile_context>

<pallas_src>
import functools

import jax
import jax.numpy as jnp
from jax import lax
from jax.experimental import pallas as pl
from jax.experimental.pallas import tpu as pltpu

LANE = 128
SUBLANE = 8


def _round_up(x, m):
    return (x + m - 1) // m * m


def _vanet_kernel(n_layers, batch, action_dim, x_ref, w_ref, b_ref, q_ref):
    """x_ref:(Bp,D) bf16, w_ref:(L,D,D) bf16, b_ref:(L,1,D) f32, q_ref:(Bp,D) f32."""
    h = x_ref[...]  # bf16, lane-dense (batch_pad, D)

    # Hidden layers: relu(h @ W_i + b_i), f32 accumulate, back to bf16 for MXU.
    for i in range(n_layers - 1):
        acc = jnp.dot(h, w_ref[i], preferred_element_type=jnp.float32) + b_ref[i]
        h = jnp.maximum(acc, 0.0).astype(jnp.bfloat16)

    # Fused head (last slab): columns [0, action_dim) = adv, column action_dim = v,
    # remaining lanes are zero-weight padding.
    out = (jnp.dot(h, w_ref[n_layers - 1], preferred_element_type=jnp.float32)
           + b_ref[n_layers - 1])

    lane = lax.broadcasted_iota(jnp.int32, out.shape, 1)
    row = lax.broadcasted_iota(jnp.int32, out.shape, 0)

    # adv.mean() over ALL real adv elements (exclude padded rows / padded lanes),
    # with a compile-time-constant reciprocal (no runtime divide).
    adv_mask = (lane < action_dim) & (row < batch)
    adv_mean = jnp.sum(jnp.where(adv_mask, out, 0.0)) * (1.0 / float(batch * action_dim))

    # Broadcast the v column (lane == action_dim) across lanes via a masked
    # cross-lane reduction (XLU slot, otherwise idle here).
    v_col = jnp.sum(jnp.where(lane == action_dim, out, 0.0), axis=1, keepdims=True)

    # Lane-dense 128-wide store; padded lanes hold garbage and are sliced off
    # by the wrapper.
    q_ref[...] = out + v_col - adv_mean


def pack_params(params, state_dim, action_dim):
    """Pack & pad params ONCE (cache the result; do NOT call per forward).

    params: [(W, b)] for hidden layers, then (Wa, ba), (Wv, bv); W stored as
    (in_features, out_features) f32, b as (1, out_features) f32.
    Returns (w_stack, b_stack): (n_layers, D, D) bf16 and (n_layers, 1, D) f32,
    where the last slab is the fused [adv | v] head.
    """
    n_hidden = len(params) - 2
    hidden_dims = [int(w.shape[1]) for (w, _) in params[:n_hidden]]

    wa, ba = params[n_hidden]
    wv, bv = params[n_hidden + 1]
    w_head = jnp.concatenate([wa, wv], axis=1)   # (hidden, action_dim + 1)
    b_head = jnp.concatenate([ba, bv], axis=1)   # (1, action_dim + 1)

    layers = list(params[:n_hidden]) + [(w_head, b_head)]
    in_dims = [state_dim] + hidden_dims
    out_dims = hidden_dims + [action_dim + 1]
    d = _round_up(max(in_dims + out_dims), LANE)   # uniform padded tile side

    n_layers = n_hidden + 1
    w_stack = jnp.zeros((n_layers, d, d), jnp.bfloat16)
    b_stack = jnp.zeros((n_layers, 1, d), jnp.float32)
    for i, (w, b) in enumerate(layers):
        ki, ni = int(w.shape[0]), int(w.shape[1])
        w_stack = w_stack.at[i, :ki, :ni].set(w.astype(jnp.bfloat16))
        b_stack = b_stack.at[i, 0, :ni].set(b.reshape(-1).astype(jnp.float32))
    return w_stack, b_stack


@functools.partial(jax.jit, static_argnames=("action_dim",))
def vanet_forward(x, w_stack, b_stack, *, action_dim):
    """x: (batch, state_dim) f32.  w_stack/b_stack from pack_params (pre-packed)."""
    batch, state_dim = x.shape
    n_layers, d, _ = w_stack.shape
    batch_pad = _round_up(batch, SUBLANE)

    # Only per-call host-side prep: lane-dense bf16 x (zero padding keeps math exact).
    x_pad = jnp.zeros((batch_pad, d), jnp.bfloat16).at[:batch, :state_dim].set(
        x.astype(jnp.bfloat16))

    kernel = functools.partial(_vanet_kernel, int(n_layers), int(batch), int(action_dim))

    flops = 2 * batch_pad * d * d * n_layers          # advisory (padded) flops
    bytes_accessed = (x_pad.size * 2 + w_stack.size * 2 + b_stack.size * 4
                      + batch_pad * d * 4)
    cost = pl.CostEstimate(flops=int(flops), transcendentals=0,
                           bytes_accessed=int(bytes_accessed))

    vmem = pl.BlockSpec(memory_space=pltpu.MemorySpace.VMEM)
    q_pad = pl.pallas_call(
        kernel,
        out_shape=jax.ShapeDtypeStruct((batch_pad, d), jnp.float32),
        in_specs=[vmem, vmem, vmem],
        out_specs=vmem,
        cost_estimate=cost,
    )(x_pad, w_stack, b_stack)

    # Load-bearing slice: everything outside [:batch, :action_dim] is garbage.
    return q_pad[:batch, :action_dim]


def init_linear(key, in_dim, out_dim):
    # PyTorch nn.Linear default init: U(-1/sqrt(fan_in), 1/sqrt(fan_in))
    kw, kb = jax.random.split(key)
    bound = 1.0 / jnp.sqrt(jnp.float32(in_dim))
    w = jax.random.uniform(kw, (in_dim, out_dim), jnp.float32, -bound, bound)
    b = jax.random.uniform(kb, (1, out_dim), jnp.float32, -bound, bound)
    return w, b


def vanet_reference(x, params):
    """Pure-JAX reference with the same bf16-operand / f32-accumulate numerics."""
    n_hidden = len(params) - 2
    h = x.astype(jnp.bfloat16)
    for i in range(n_hidden):
        w, b = params[i]
        acc = jnp.dot(h, w.astype(jnp.bfloat16),
                      preferred_element_type=jnp.float32) + b
        h = jnp.maximum(acc, 0.0).astype(jnp.bfloat16)
    wa, ba = params[n_hidden]
    wv, bv = params[n_hidden + 1]
    adv = jnp.dot(h, wa.astype(jnp.bfloat16),
                  preferred_element_type=jnp.float32) + ba
    v = jnp.dot(h, wv.astype(jnp.bfloat16),
                preferred_element_type=jnp.float32) + bv
    return v + adv - jnp.mean(adv)


if __name__ == "__main__":
    # Small shapes consistent with the module's forward (pure MLP on state vectors).
    batch = 8
    state_dim = 4
    hidden_layers_dim = [32, 32]
    action_dim = 4

    key = jax.random.PRNGKey(0)
    keys = jax.random.split(key, len(hidden_layers_dim) + 3)

    params = []
    in_dim = state_dim
    for i, h in enumerate(hidden_layers_dim):
        params.append(init_linear(keys[i], in_dim, h))
        in_dim = h
    params.append(init_linear(keys[len(hidden_layers_dim)], in_dim, action_dim))  # adv head
    params.append(init_linear(keys[len(hidden_layers_dim) + 1], in_dim, 1))       # v head

    x = jax.random.normal(keys[-1], (batch, state_dim), jnp.float32)

    # Pack ONCE (whenever params change), reuse across forwards.
    w_stack, b_stack = pack_params(params, state_dim, action_dim)
    w_stack, b_stack = jax.block_until_ready((w_stack, b_stack))

    q = vanet_forward(x, w_stack, b_stack, action_dim=action_dim)
    q = jax.block_until_ready(q)

    q_ref = vanet_reference(x, params)
    assert q.shape == (batch, action_dim)
    assert jnp.allclose(q, q_ref, atol=2e-3, rtol=2e-3), "mismatch vs reference"

    print("KERNEL_OK")
</pallas_src>

<mosaic_0001>
module attributes {stable_mosaic.version = 11 : i64} {
  func.func @_vanet_kernel(%arg0: memref<8x128xbf16, #tpu.memory_space<vmem>>, %arg1: memref<3x128x128xbf16, #tpu.memory_space<vmem>>, %arg2: memref<3x1x128xf32, #tpu.memory_space<vmem>>, %arg3: memref<8x128xf32, #tpu.memory_space<vmem>>) attributes {dimension_semantics = [], scalar_prefetch = 0 : i64, scratch_operands = 0 : i64, tpu.core_type = #tpu.core_type<tc>} {
    %c0 = arith.constant 0 : index
    %c0_0 = arith.constant 0 : index
    %0 = vector.load %arg0[%c0, %c0_0] : memref<8x128xbf16, #tpu.memory_space<vmem>>, vector<8x128xbf16>
    %c0_1 = arith.constant 0 : index
    %c0_2 = arith.constant 0 : index
    %c0_3 = arith.constant 0 : index
    %1 = vector.load %arg1[%c0_1, %c0_2, %c0_3] : memref<3x128x128xbf16, #tpu.memory_space<vmem>>, vector<1x128x128xbf16>
    %2 = vector.shape_cast %1 : vector<1x128x128xbf16> to vector<128x128xbf16>
    %cst = arith.constant dense<0.000000e+00> : vector<8x128xf32>
    %3 = tpu.matmul %0, %2, %cst {dimension_numbers = #tpu.dot_dimension_numbers<[1], [0], [0], [1], [0, 0, 1, 1], [], []>} : vector<8x128xbf16>, vector<128x128xbf16>, vector<8x128xf32> -> vector<8x128xf32>
    %c0_4 = arith.constant 0 : index
    %c0_5 = arith.constant 0 : index
    %c0_6 = arith.constant 0 : index
    %4 = vector.load %arg2[%c0_4, %c0_5, %c0_6] : memref<3x1x128xf32, #tpu.memory_space<vmem>>, vector<1x1x128xf32>
    %5 = vector.shape_cast %4 : vector<1x1x128xf32> to vector<1x128xf32>
    %6 = vector.broadcast %5 : vector<1x128xf32> to vector<8x128xf32>
    %7 = arith.addf %3, %6 : vector<8x128xf32>
    %cst_7 = arith.constant 0.000000e+00 : f32
    %8 = vector.broadcast %cst_7 : f32 to vector<8x128xf32>
    %9 = arith.maximumf %7, %8 : vector<8x128xf32>
    %10 = arith.truncf %9 : vector<8x128xf32> to vector<8x128xbf16>
    %c1 = arith.constant 1 : index
    %c0_8 = arith.constant 0 : index
    %c0_9 = arith.constant 0 : index
    %11 = vector.load %arg1[%c1, %c0_8, %c0_9] : memref<3x128x128xbf16, #tpu.memory_space<vmem>>, vector<1x128x128xbf16>
    %12 = vector.shape_cast %11 : vector<1x128x128xbf16> to vector<128x128xbf16>
    %cst_10 = arith.constant dense<0.000000e+00> : vector<8x128xf32>
    %13 = tpu.matmul %10, %12, %cst_10 {dimension_numbers = #tpu.dot_dimension_numbers<[1], [0], [0], [1], [0, 0, 1, 1], [], []>} : vector<8x128xbf16>, vector<128x128xbf16>, vector<8x128xf32> -> vector<8x128xf32>
    %c1_11 = arith.constant 1 : index
    %c0_12 = arith.constant 0 : index
    %c0_13 = arith.constant 0 : index
    %14 = vector.load %arg2[%c1_11, %c0_12, %c0_13] : memref<3x1x128xf32, #tpu.memory_space<vmem>>, vector<1x1x128xf32>
    %15 = vector.shape_cast %14 : vector<1x1x128xf32> to vector<1x128xf32>
    %16 = vector.broadcast %15 : vector<1x128xf32> to vector<8x128xf32>
    %17 = arith.addf %13, %16 : vector<8x128xf32>
    %cst_14 = arith.constant 0.000000e+00 : f32
    %18 = vector.broadcast %cst_14 : f32 to vector<8x128xf32>
    %19 = arith.maximumf %17, %18 : vector<8x128xf32>
    %20 = arith.truncf %19 : vector<8x128xf32> to vector<8x128xbf16>
    %c2 = arith.constant 2 : index
    %c0_15 = arith.constant 0 : index
    %c0_16 = arith.constant 0 : index
    %21 = vector.load %arg1[%c2, %c0_15, %c0_16] : memref<3x128x128xbf16, #tpu.memory_space<vmem>>, vector<1x128x128xbf16>
    %22 = vector.shape_cast %21 : vector<1x128x128xbf16> to vector<128x128xbf16>
    %cst_17 = arith.constant dense<0.000000e+00> : vector<8x128xf32>
    %23 = tpu.matmul %20, %22, %cst_17 {dimension_numbers = #tpu.dot_dimension_numbers<[1], [0], [0], [1], [0, 0, 1, 1], [], []>} : vector<8x128xbf16>, vector<128x128xbf16>, vector<8x128xf32> -> vector<8x128xf32>
    %c2_18 = arith.constant 2 : index
    %c0_19 = arith.constant 0 : index
    %c0_20 = arith.constant 0 : index
    %24 = vector.load %arg2[%c2_18, %c0_19, %c0_20] : memref<3x1x128xf32, #tpu.memory_space<vmem>>, vector<1x1x128xf32>
    %25 = vector.shape_cast %24 : vector<1x1x128xf32> to vector<1x128xf32>
    %26 = vector.broadcast %25 : vector<1x128xf32> to vector<8x128xf32>
    %27 = arith.addf %23, %26 : vector<8x128xf32>
    %28 = tpu.iota {dimensions = array<i32: 1>} : vector<8x128xi32>
    %29 = tpu.iota {dimensions = array<i32: 0>} : vector<8x128xi32>
    %c4_i32 = arith.constant 4 : i32
    %30 = vector.broadcast %c4_i32 : i32 to vector<8x128xi32>
    %31 = arith.cmpi slt, %28, %30 : vector<8x128xi32>
    %c8_i32 = arith.constant 8 : i32
    %32 = vector.broadcast %c8_i32 : i32 to vector<8x128xi32>
    %33 = arith.cmpi slt, %29, %32 : vector<8x128xi32>
    %34 = arith.andi %31, %33 : vector<8x128xi1>
    %cst_21 = arith.constant 0.000000e+00 : f32
    %35 = vector.broadcast %cst_21 : f32 to vector<8x128xf32>
    %36 = arith.select %34, %27, %35 : vector<8x128xi1>, vector<8x128xf32>
    %37 = vector.shape_cast %36 : vector<8x128xf32> to vector<1x8x128xf32>
    %cst_22 = arith.constant dense<0.000000e+00> : vector<1xf32>
    %38 = vector.multi_reduction <add>, %37, %cst_22 [1, 2] : vector<1x8x128xf32> to vector<1xf32>
    %39 = vector.shape_cast %38 : vector<1xf32> to vector<1x1x1xf32>
    %40 = vector.extract %39[0, 0, 0] : f32 from vector<1x1x1xf32>
    %cst_23 = arith.constant 3.125000e-02 : f32
    %41 = arith.mulf %40, %cst_23 : f32
    %c4_i32_24 = arith.constant 4 : i32
    %42 = vector.broadcast %c4_i32_24 : i32 to vector<8x128xi32>
    %43 = arith.cmpi eq, %28, %42 : vector<8x128xi32>
    %cst_25 = arith.constant 0.000000e+00 : f32
    %44 = vector.broadcast %cst_25 : f32 to vector<8x128xf32>
    %45 = arith.select %43, %27, %44 : vector<8x128xi1>, vector<8x128xf32>
    %cst_26 = arith.constant dense<0.000000e+00> : vector<8xf32>
    %46 = vector.multi_reduction <add>, %45, %cst_26 [1] : vector<8x128xf32> to vector<8xf32>
    %47 = vector.shape_cast %46 : vector<8xf32> to vector<8x1xf32>
    %48 = vector.broadcast %47 : vector<8x1xf32> to vector<8x128xf32>
    %49 = arith.addf %27, %48 : vector<8x128xf32>
    %50 = vector.broadcast %41 : f32 to vector<8x128xf32>
    %51 = arith.subf %49, %50 : vector<8x128xf32>
    %c0_27 = arith.constant 0 : index
    %c0_28 = arith.constant 0 : index
    %52 = vector.load %arg3[%c0_27, %c0_28] : memref<8x128xf32, #tpu.memory_space<vmem>>, vector<8x128xf32>
    tpu.vector_store %arg3[%c0_27, %c0_28], %51 {strides = array<i32>} : memref<8x128xf32, #tpu.memory_space<vmem>>, vector<8x128xf32>,
    return
  }
}

</mosaic_0001>

<bundles_post_ra>
// kernel: vanet_forward.1
= control target key start
LH: loop header
LB: loop body
LE: loop exit
PB: predicated region body
PF: predicated region fallthrough
CT: control target
= control target key end

     0   :  { %8 = vsyncpa [#allocation3], 0  ;;  %s571_s12 = smov [#allocation2]   ;;  %s644_s0 = inlined_call_operand.vmem [shape: bf16[8,128], index: 0, kind: input, shape index: {}]   ;;  %s645_s1 = inlined_call_operand.hbm [shape: bf16[3,128,128], index: 1, kind: input, shape index: {}]   ;;  %s646_s2 = inlined_call_operand.vmem [shape: f32[3,1,128], index: 2, kind: input, shape index: {}]   ;;  %s647_s3 = inlined_call_operand.vmem [shape: f32[8,128], index: 3, kind: output, shape index: {}]  }
   0x1   :  { %s16_s13 = sshll.u32 %s571_s12, 4  ;;  %s17_s13 = int_to_ptr.vmem [resolvable:$true] %s16_s13 }
   0x2   :  { %s557_s14 = scalar_lea.vmem %s17_s13, 3072  ;;  %p562_p1 = scmp.lt.s32.totalorder %s17_s13, %s17_s13 }
   0x3   :  { %p558_p0 = scmp.ne.s32.totalorder %s17_s13, %s557_s14  ;;  %p563_p2 = scmp.lt.s32.totalorder %s557_s14, %s557_s14 }
   0x5   :  { %p564_p3 = por %p563_p2, %p562_p1 }
   0x7   :  { %p565_p4 = pnand %p564_p3, %p558_p0 }
   0x9   :  { %568 = shalt.err (!%p565_p4)
}
   0xa   :  { %s572_s15 = smov 64   ;;  %s573_s16 = smov 4  }
   0xb   :  { %22 = dma.hbm_to_vmem [thread:$0]  %s645_s1, 3072, %s17_s13, [#allocation3], %s572_s15, %s572_s15, %s573_s16  }
   0xc   :  { %569 = dma.done.wait [#allocation3], 3072  }
   0xd   :  { %570 = vsyncadd [#allocation3], 4294964224  ;;  %v574_v0 = vmov 0.0   ;;  %vm575_vm0 = vmmov 0   ;;  %v525_v1 = vld [vmem:[#allocation2 + $0x38] sm:$0xff]   ;;  %v526_v2 = vld [vmem:[#allocation2 + $0x30] sm:$0xff]   ;;  %v371_v42 = vlaneseq }
   0xe   :  { %458 = vmatprep.subr.bf16.mxu0 %v574_v0  ;;  %474 = vmatprep.mubr.msk.bf16.mxu0 %vm575_vm0, %v574_v0  ;;  %v527_v3 = vld [vmem:[#allocation2 + $0x28] sm:$0xff]   ;;  %v533_v4 = vld [vmem:[#allocation2 + $0x78] sm:$0xff]   ;;  %v528_v5 = vld [vmem:[#allocation2 + $0x20] sm:$0xff]  }
   0xf   :  { %478 = vmatprep.subr.bf16.mxu1 %v574_v0  ;;  %494 = vmatprep.mubr.msk.bf16.mxu1 %vm575_vm0, %v574_v0  ;;  %v534_v6 = vld [vmem:[#allocation2 + $0x70] sm:$0xff]   ;;  %v529_v7 = vld [vmem:[#allocation2 + $0x18] sm:$0xff]   ;;  %v535_v8 = vld [vmem:[#allocation2 + $0x68] sm:$0xff]   ;;  %v372_v43 = vand.u32 127, %v371_v42 }
  0x10   :  { %459 = vmatpush3.bf16.msra.mxu0 %v525_v1  ;;  %479 = vmatpush3.bf16.msra.mxu1 %v533_v4  ;;  %v530_v9 = vld [vmem:[#allocation2 + $0x10] sm:$0xff]   ;;  %v536_v10 = vld [vmem:[#allocation2 + $0x60] sm:$0xff]   ;;  %v531_v11 = vld [vmem:[#allocation2 + $0x8] sm:$0xff]  }
  0x11   :  { %460 = vmatprep.subr.bf16.mxu0 %v574_v0  ;;  %480 = vmatprep.subr.bf16.mxu1 %v574_v0  ;;  %v537_v12 = vld [vmem:[#allocation2 + $0x58] sm:$0xff]   ;;  %v532_v13 = vld [vmem:[#allocation2] sm:$0xff]   ;;  %v538_v14 = vld [vmem:[#allocation2 + $0x50] sm:$0xff]   ;;  %vm375_vm1 = vcmp.lt.s32.totalorder %v372_v43, 4  ;;  %vm389_vm2 = vcmp.eq.s32.totalorder %v372_v43, 4 }
  0x12   :  { %v29_v15 = vld [vmem:[%s644_s0] sm:$0xf]  ;;  %v539_v16 = vld [vmem:[#allocation2 + $0x48] sm:$0xff]   ;;  %v541_v18 = vld [vmem:[#allocation2 + $0xb8] sm:$0xff]  }
  0x13   :  { %v540_v17 = vld [vmem:[#allocation2 + $0x40] sm:$0xff]   ;;  %v542_v19 = vld [vmem:[#allocation2 + $0xb0] sm:$0xff]   ;;  %v543_v20 = vld [vmem:[#allocation2 + $0xa8] sm:$0xff]  }
  0x14   :  { %461 = vmatpush3.bf16.msra.mxu0 %v526_v2  ;;  %481 = vmatpush3.bf16.msra.mxu1 %v534_v6  ;;  %v544_v21 = vld [vmem:[#allocation2 + $0xa0] sm:$0xff]   ;;  %v545_v22 = vld [vmem:[#allocation2 + $0x98] sm:$0xff]   ;;  %v546_v23 = vld [vmem:[#allocation2 + $0x90] sm:$0xff]  }
  0x15   :  { %462 = vmatprep.subr.bf16.mxu0 %v574_v0  ;;  %482 = vmatprep.subr.bf16.mxu1 %v574_v0  ;;  %v402_v24 = vld [vmem:[%s646_s2] ss:$0 sm:$0xff]  ;;  %v547_v32 = vld [vmem:[#allocation2 + $0x88] sm:$0xff]   ;;  %v412_v34 = vld [vmem:[%s646_s2 + $0x1] ss:$0 sm:$0xff] }
  0x16   :  { %v548_v33 = vld [vmem:[#allocation2 + $0x80] sm:$0xff]  }
  0x17   :  { %v422_v44 = vld [vmem:[%s646_s2 + $0x2] ss:$0 sm:$0xff] }
  0x18   :  { %463 = vmatpush3.bf16.msra.mxu0 %v527_v3  ;;  %483 = vmatpush3.bf16.msra.mxu1 %v535_v8 }
  0x19   :  { %464 = vmatprep.subr.bf16.mxu0 %v574_v0  ;;  %484 = vmatprep.subr.bf16.mxu1 %v574_v0 }
  0x1c   :  { %465 = vmatpush3.bf16.msra.mxu0 %v528_v5  ;;  %485 = vmatpush3.bf16.msra.mxu1 %v536_v10 }
  0x1d   :  { %466 = vmatprep.subr.bf16.mxu0 %v574_v0  ;;  %486 = vmatprep.subr.bf16.mxu1 %v574_v0 }
  0x20   :  { %467 = vmatpush3.bf16.msra.mxu0 %v529_v7  ;;  %487 = vmatpush3.bf16.msra.mxu1 %v537_v12 }
  0x21   :  { %468 = vmatprep.subr.bf16.mxu0 %v574_v0  ;;  %488 = vmatprep.subr.bf16.mxu1 %v574_v0 }
  0x24   :  { %469 = vmatpush3.bf16.msra.mxu0 %v530_v9  ;;  %489 = vmatpush3.bf16.msra.mxu1 %v538_v14 }
  0x25   :  { %470 = vmatprep.subr.bf16.mxu0 %v574_v0  ;;  %490 = vmatprep.subr.bf16.mxu1 %v574_v0 }
  0x28   :  { %471 = vmatpush3.bf16.msra.mxu0 %v531_v11  ;;  %491 = vmatpush3.bf16.msra.mxu1 %v539_v16 }
  0x29   :  { %472 = vmatprep.subr.bf16.mxu0 %v574_v0  ;;  %492 = vmatprep.subr.bf16.mxu1 %v574_v0 }
  0x2c   :  { %473 = vmatpush3.bf16.msra.mxu0 %v532_v13  ;;  %493 = vmatpush3.bf16.msra.mxu1 %v540_v17 }
  0x2d   :  { %498 = vmatprep.subr.bf16.mxu0 %v574_v0 }
  0x2f   :  { %475 = vmatmul.mubr.bf16.vlgmr.msra.gmra.mxu0 %v29_v15 }
  0x30   :  { %514 = vmatprep.mubr.msk.bf16.mxu0 %vm575_vm0, %v574_v0  ;;  %499 = vmatpush3.bf16.msra.mxu0 %v541_v18 }
  0x31   :  { %500 = vmatprep.subr.bf16.mxu0 %v574_v0 }
  0x34   :  { %501 = vmatpush3.bf16.msra.mxu0 %v542_v19 }
  0x35   :  { %502 = vmatprep.subr.bf16.mxu0 %v574_v0 }
  0x38   :  { %503 = vmatpush3.bf16.msra.mxu0 %v543_v20 }
  0x39   :  { %504 = vmatprep.subr.bf16.mxu0 %v574_v0 }
  0x3c   :  { %505 = vmatpush3.bf16.msra.mxu0 %v544_v21 }
  0x3d   :  { %506 = vmatprep.subr.bf16.mxu0 %v574_v0 }
  0x40   :  { %507 = vmatpush3.bf16.msra.mxu0 %v545_v22 }
  0x41   :  { %508 = vmatprep.subr.bf16.mxu0 %v574_v0 }
  0x44   :  { %509 = vmatpush3.bf16.msra.mxu0 %v546_v23 }
  0x45   :  { %510 = vmatprep.subr.bf16.mxu0 %v574_v0 }
  0x48   :  { %511 = vmatpush3.bf16.msra.mxu0 %v547_v32 }
  0x49   :  { %512 = vmatprep.subr.bf16.mxu0 %v574_v0 }
  0x4c   :  { %513 = vmatpush3.bf16.msra.mxu0 %v548_v33 }
  0xef   :  { %v135_v25 = vpop.f32.mrf.mxu0 }
  0xf0   :  { %v136_v26 = vadd.f32 %v402_v24, %v135_v25 }
  0xf1   :  { %v476_v27 = vpop.f32.mrf.mxu0 }
  0xf2   :  { %v141_v28 = vmax.f32 %v136_v26, 0.0 }
  0xf3   :  { %v138_v29 = vpop.f32.mrf.mxu0 }
  0xf4   :  { %v142_v30 = vpack.c.bf16 %v141_v28, %v141_v28 }
  0xf5   :  { %v477_v31 = vpop.f32.mrf.mxu0 }
  0xf6   :  { %495 = vmatmul.mubr.bf16.vlgmr.msra.gmra.mxu1 %v142_v30 }
 0x1b6   :  { %v250_v35 = vpop.f32.mrf.mxu1 }
 0x1b7   :  { %v251_v36 = vadd.f32 %v412_v34, %v250_v35 }
 0x1b8   :  { %v496_v37 = vpop.f32.mrf.mxu1 }
 0x1b9   :  { %v256_v38 = vmax.f32 %v251_v36, 0.0 }
 0x1ba   :  { %v253_v39 = vpop.f32.mrf.mxu1 }
 0x1bb   :  { %v257_v40 = vpack.c.bf16 %v256_v38, %v256_v38 }
 0x1bc   :  { %v497_v41 = vpop.f32.mrf.mxu1 }
 0x1bd   :  { %515 = vmatmul.mubr.bf16.vlgmr.msra.gmra.mxu0 %v257_v40 }
 0x27d   :  { %v365_v45 = vpop.f32.mrf.mxu0 }
 0x27e   :  { %v366_v46 = vadd.f32 %v422_v44, %v365_v45 }
 0x27f   :  { %v516_v47 = vpop.f32.mrf.mxu0 }
 0x280   :  { %v378_v48 = vsel %vm375_vm1, %v366_v46, 0.0  ;;  %v390_v51 = vsel %vm389_vm2, %v366_v46, 0.0 }
 0x281   :  { %379 = vadd.xlane.f32.xlu0 %v378_v48  ;;  %v368_v49 = vpop.f32.mrf.mxu0 }
 0x283   :  { %v517_v50 = vpop.f32.mrf.mxu0 }
 0x285   :  { %391 = vadd.xlane.f32.xlu0 %v390_v51 }
 0x30a   :  { %v380_v52 = vpop.xlane.xlu0 %379 }
 0x30b   :  { %v381_v53 = vrot.slane %v380_v52, 4 }
 0x30d   :  { %v382_v54 = vadd.f32 %v381_v53, %v380_v52 }
 0x30e   :  { %v392_v59 = vpop.xlane.xlu0 %391 }
 0x30f   :  { %v383_v55 = vrot.slane %v382_v54, 2  ;;  %v393_v60 = vadd.f32 %v392_v59, %v366_v46 }
 0x311   :  { %v384_v56 = vadd.f32 %v383_v55, %v382_v54 }
 0x313   :  { %v385_v57 = vrot.slane %v384_v56, 1 }
 0x315   :  { %v386_v58 = vadd.f32 %v385_v57, %v384_v56 }
 0x317   :  { %518 = vpush %v386_v58 }
 0x348   :  { %s519_s2 = spop %518 }
 0x349   :  { %s388_s25 = smul.f32 0.03125, %s519_s2 }
 0x34b   :  { %v394_v61 = vstv %s388_s25 }
 0x34c   :  { %v395_v62 = vsub.f32 %v393_v60, %v394_v61 }
 0x34e   :  { %396 = vst [vmem:[%s647_s3] sm:$0xff] %v395_v62 }
 0x34f   :  { %401 = vsyncpa [#allocation3], 1 }

</bundles_post_ra>
